<compile_context>
chip_gen: v6e
topology: v6e:2x2x1
jax: 0.10.0
libtpu: 0.0.40
codegen_flags: <defaults>
</compile_context>

<pallas_src>
import functools

import jax
import jax.numpy as jnp
import numpy as np
from jax import lax
from jax.experimental import pallas as pl
from jax.experimental.pallas import tpu as pltpu


# ----------------------------------------------------------------------------------------
# Stage 1: Chebyshev recursion T_0 .. T_{K-1} in batch-folded layout (N, Bt*Cin).
# ----------------------------------------------------------------------------------------
def _cheb_recursion_kernel(x_ref, l2_ref, t_ref, *, K, unroll_k):
    """x_ref: (N, W) MXU dtype; l2_ref: (N, N) holding 2*L; t_ref: (K, N, W) MXU dtype."""
    f32 = jnp.float32
    cdt = t_ref.dtype

    x_c = x_ref[...]                                   # T_0, already in the MXU dtype
    t_ref[0] = x_c
    if K == 1:
        return                                         # torch computes L@x here but never uses it

    L2 = l2_ref[...]                                   # 2 * L
    T_pp = x_c.astype(f32)                             # T_{j-2}, kept in f32
    T_p = 0.5 * jnp.dot(L2, x_c, preferred_element_type=f32)   # T_1 = L @ x  (f32)
    T_pc = T_p.astype(cdt)                             # cast ONCE: reused for store + next matmul
    t_ref[1] = T_pc

    if unroll_k:
        for _j in range(2, K):                         # K is a static Python int -> unrolled
            T_j = jnp.dot(L2, T_pc, preferred_element_type=f32) - T_pp
            T_jc = T_j.astype(cdt)
            t_ref[_j] = T_jc
            T_pp, T_p, T_pc = T_p, T_j, T_jc
    else:
        # Large K: bound live state to (T_{j-2}, T_{j-1}) instead of an unrolled K-deep chain.
        def body(j, carry):
            T_pp, T_p, T_pc = carry
            T_j = jnp.dot(L2, T_pc, preferred_element_type=f32) - T_pp
            T_jc = T_j.astype(cdt)
            t_ref[j] = T_jc
            return (T_p, T_j, T_jc)

        lax.fori_loop(2, K, body, (T_pp, T_p, T_pc))


# ----------------------------------------------------------------------------------------
# Stage 2: one dense stacked weight matmul  out = T_flat @ W_stack.
# ----------------------------------------------------------------------------------------
def _weight_matmul_kernel(t_ref, w_ref, o_ref):
    o_ref[...] = jnp.dot(t_ref[...], w_ref[...],
                         preferred_element_type=jnp.float32).astype(o_ref.dtype)


# ----------------------------------------------------------------------------------------
# Wrapper helpers.
# ----------------------------------------------------------------------------------------
def _vmem_capacity_bytes():
    try:
        return int(pltpu.get_tpu_info().vmem_capacity_bytes)
    except Exception:                  # capability probe only; assume the smallest chip (v7x)
        return 64 << 20


def _choose_batch_tile(B, Cin, *, max_lanes):
    """Pick a batch tile Bt dividing B.

    Legality ((8,128) rule): the folded lane width Bt*Cin must be a multiple of 128 unless
    Bt == B (block shape == full array dims).  Preference order among legal candidates:
      1. at least 2 grid steps (lets the 'parallel' axis shard over both v7x TensorCores),
      2. folded width fits the VMEM-derived lane budget,
      3. lane-dense (multiple-of-128) folded width,
      4. as wide as possible (wide MXU RHS amortizes resident L), else as narrow as possible.
    """
    cands = [bt for bt in range(1, B + 1)
             if B % bt == 0 and ((bt * Cin) % 128 == 0 or bt == B)]

    def score(bt):
        w = bt * Cin
        fits = w <= max_lanes
        return ((B // bt) >= 2, fits, w % 128 == 0, w if fits else -w)

    return max(cands, key=score)


def _choose_row_tile(M, *, target=1024):
    """Row tile for the stage-2 matmul: full M if small, else a divisor that keeps (8,·) legality."""
    if M <= target:
        return M
    for tm in range(target, 7, -1):
        if M % tm == 0 and tm % 8 == 0:
            return tm
    return M   # single full block is always legal


# ----------------------------------------------------------------------------------------
# Public entry point.
# ----------------------------------------------------------------------------------------
def cheb_conv(x, L, W, *, matmul_dtype=jnp.bfloat16, batch_tile=None, interpret=False):
    """Chebyshev graph conv.  x:(B,N,Cin), L:(N,N), W:(K,Cin,Cout)=stacked W_j^T -> (B,N,Cout).

    matmul_dtype: dtype fed to the MXU.  bf16 (default) is the perf path (recursion state and
    accumulation stay f32); pass jnp.float32 for a faithful f32 port of the PyTorch module.
    """
    B, N, Cin = x.shape
    K, Cin2, Cout = W.shape
    assert Cin == Cin2 and L.shape == (N, N)
    out_dtype = x.dtype
    cdt = jnp.dtype(matmul_dtype)
    csz = cdt.itemsize
    cap = _vmem_capacity_bytes()

    # ------------------------- stage 1: recursion over batch tiles -------------------------
    # VMEM per folded lane column: x block (2 bufs) + T_all block (2 bufs, K terms) + ~2 cast
    # temporaries in the MXU dtype, plus ~3 f32 recursion temporaries.
    per_lane = N * ((6 + 2 * K) * csz + 3 * 4)
    lane_budget = int(0.7 * cap) - 2 * N * N * csz            # keep room for (double-buffered) L
    max_lanes = max(128, min(2048, (max(lane_budget, 0) // max(per_lane, 1)) // 128 * 128))

    Bt = batch_tile if batch_tile is not None else _choose_batch_tile(B, Cin, max_lanes=max_lanes)
    if B % Bt != 0:
        raise ValueError(f"batch_tile={Bt} must divide B={B}")
    nb = B // Bt
    w_lanes = Bt * Cin
    if nb > 1 and w_lanes % 128 != 0:
        raise ValueError(
            f"batch_tile*Cin={w_lanes} must be a multiple of 128 when B/batch_tile > 1")

    need = 2 * N * N * csz + per_lane * w_lanes
    if need > int(0.8 * cap):
        # Fail loudly instead of clamping vmem_limit below the real footprint.
        raise ValueError(
            f"chebConv stage-1 VMEM footprint ~{need >> 20} MiB exceeds 80% of VMEM "
            f"({cap >> 20} MiB); reduce batch_tile / implement the L-tiled path.")
    vmem1 = min(max(int(need * 1.3) + (4 << 20), 32 << 20), int(0.9 * cap))

    # Fold the batch into the lane dim: X_wide[n, b*Cin + c] = x[b, n, c].  Cast MXU inputs in
    # the wrapper (halves x DMA bytes on the bf16 path); pre-scale L to 2L (exact power-of-two).
    xw = jnp.transpose(x, (1, 0, 2)).reshape(N, B * Cin).astype(cdt)
    l2 = (2.0 * L).astype(cdt)

    t_all = pl.pallas_call(
        functools.partial(_cheb_recursion_kernel, K=K, unroll_k=(K <= 8)),
        out_shape=jax.ShapeDtypeStruct((K, N, B * Cin), cdt),
        grid_spec=pltpu.PrefetchScalarGridSpec(
            num_scalar_prefetch=0,
            grid=(nb,),                                               # one step per batch tile
            in_specs=[
                pl.BlockSpec((N, w_lanes), lambda i: (0, i)),         # folded x tile
                pl.BlockSpec((N, N), lambda i: (0, 0)),               # 2L: grid-invariant
            ],
            out_specs=pl.BlockSpec((K, N, w_lanes), lambda i: (0, 0, i)),
        ),
        compiler_params=pltpu.CompilerParams(
            dimension_semantics=("parallel",),                        # batch tiles independent
            vmem_limit_bytes=vmem1,
        ),
        interpret=interpret,
    )(xw, l2)

    # --------------------- stage 2: dense stacked weight application -----------------------
    # out[b,n,o] = sum_{j,c} T_j[b,n,c] * W[j,c,o]  ==  T_flat @ W_stack (no zero blocks).
    BN, KC = B * N, K * Cin
    t_flat = jnp.transpose(t_all.reshape(K, N, B, Cin), (2, 1, 0, 3)).reshape(BN, KC)
    w_stack = W.reshape(KC, Cout).astype(cdt)

    tm = _choose_row_tile(BN)
    need2 = 2 * (tm * KC + KC * Cout) * csz + 3 * tm * Cout * 4
    vmem2 = min(max(int(need2 * 1.5) + (4 << 20), 16 << 20), int(0.9 * cap))

    out_flat = pl.pallas_call(
        _weight_matmul_kernel,
        out_shape=jax.ShapeDtypeStruct((BN, Cout), out_dtype),
        grid_spec=pltpu.PrefetchScalarGridSpec(
            num_scalar_prefetch=0,
            grid=(BN // tm,),
            in_specs=[
                pl.BlockSpec((tm, KC), lambda i: (i, 0)),             # stacked states row tile
                pl.BlockSpec((KC, Cout), lambda i: (0, 0)),           # weights: grid-invariant
            ],
            out_specs=pl.BlockSpec((tm, Cout), lambda i: (i, 0)),
        ),
        compiler_params=pltpu.CompilerParams(
            dimension_semantics=("parallel",),
            vmem_limit_bytes=vmem2,
        ),
        interpret=interpret,
    )(t_flat, w_stack)

    # Rows are already ordered (b, n): free reshape, no unfold transpose needed.
    return out_flat.reshape(B, N, Cout)


def cheb_conv_ref(x, L, W):
    """Pure-JAX f32 reference mirroring the PyTorch forward."""
    K = W.shape[0]
    T0 = x
    T1 = jnp.einsum("nm,bmc->bnc", L, x)
    out = jnp.einsum("bnc,co->bno", T0, W[0])
    if K >= 2:
        out = out + jnp.einsum("bnc,co->bno", T1, W[1])
    for j in range(2, K):
        T2 = 2.0 * jnp.einsum("nm,bmc->bnc", L, T1) - T0
        out = out + jnp.einsum("bnc,co->bno", T2, W[j])
        T0, T1 = T1, T2
    return out


if __name__ == "__main__":
    # Small shapes consistent with the module: B graphs of N nodes, Cin -> Cout, K Chebyshev terms.
    B, N, Cin, Cout, K = 8, 16, 8, 32, 3

    key = jax.random.PRNGKey(0)
    kx, kl, kw = jax.random.split(key, 3)

    x = jax.random.normal(kx, (B, N, Cin), dtype=jnp.float32)

    # Deterministic symmetric "scaled Laplacian"-like matrix.
    A = jax.random.normal(kl, (N, N), dtype=jnp.float32)
    L = 0.5 * (A + A.T) / N

    # nn.Linear(in, out, bias=False).weight is (Cout, Cin); forward uses x @ weight.T, so the
    # K weights are stored pre-transposed as (K, Cin, Cout).
    W = 0.1 * jax.random.normal(kw, (K, Cin, Cout), dtype=jnp.float32)

    ref = cheb_conv_ref(x, L, W)

    # Exact-f32 path: must match the pure-JAX / PyTorch semantics tightly.
    out_f32 = jax.block_until_ready(cheb_conv(x, L, W, matmul_dtype=jnp.float32))
    assert out_f32.shape == (B, N, Cout)
    np.testing.assert_allclose(np.asarray(out_f32), np.asarray(ref), rtol=1e-5, atol=1e-5)

    # Default perf path: bf16 MXU inputs with f32 recursion/accumulation.
    out_bf16 = jax.block_until_ready(cheb_conv(x, L, W))
    assert out_bf16.shape == (B, N, Cout)
    np.testing.assert_allclose(np.asarray(out_bf16), np.asarray(ref), rtol=2e-2, atol=2e-2)

    print("KERNEL_OK")
</pallas_src>

<mosaic_0001>
module attributes {stable_mosaic.version = 11 : i64} {
  func.func @_cheb_recursion_kernel(%arg0: i32, %arg1: memref<16x64xf32, #tpu.memory_space<vmem>>, %arg2: memref<16x16xf32, #tpu.memory_space<vmem>>, %arg3: memref<3x16x64xf32, #tpu.memory_space<vmem>>) attributes {dimension_semantics = [#tpu.dimension_semantics<parallel>], iteration_bounds = array<i64: 1>, scalar_prefetch = 0 : i64, scratch_operands = 0 : i64, tpu.core_type = #tpu.core_type<tc>, window_params = [{transform_indices = @transform_0, window_bounds = array<i64: 16, 64>}, {pipeline_mode = #tpu.pipeline_mode<synchronous>, transform_indices = @transform_1, window_bounds = array<i64: 16, 16>}, {transform_indices = @transform_2, window_bounds = array<i64: 3, 16, 64>}]} {
    %c0 = arith.constant 0 : index
    %c0_0 = arith.constant 0 : index
    %0 = vector.load %arg1[%c0, %c0_0] : memref<16x64xf32, #tpu.memory_space<vmem>>, vector<16x64xf32>
    %c0_1 = arith.constant 0 : index
    %c0_2 = arith.constant 0 : index
    %c0_3 = arith.constant 0 : index
    %1 = vector.load %arg3[%c0_1, %c0_2, %c0_3] : memref<3x16x64xf32, #tpu.memory_space<vmem>>, vector<1x16x64xf32>
    %2 = vector.shape_cast %1 : vector<1x16x64xf32> to vector<16x64xf32>
    %3 = vector.shape_cast %0 : vector<16x64xf32> to vector<1x16x64xf32>
    tpu.vector_store %arg3[%c0_1, %c0_2, %c0_3], %3 {strides = array<i32>} : memref<3x16x64xf32, #tpu.memory_space<vmem>>, vector<1x16x64xf32>,
    %c0_4 = arith.constant 0 : index
    %c0_5 = arith.constant 0 : index
    %4 = vector.load %arg2[%c0_4, %c0_5] : memref<16x16xf32, #tpu.memory_space<vmem>>, vector<16x16xf32>
    %cst = arith.constant dense<0.000000e+00> : vector<16x64xf32>
    %5 = tpu.matmul %4, %0, %cst {dimension_numbers = #tpu.dot_dimension_numbers<[1], [0], [0], [1], [0, 0, 1, 1], [], []>} : vector<16x16xf32>, vector<16x64xf32>, vector<16x64xf32> -> vector<16x64xf32>
    %cst_6 = arith.constant 5.000000e-01 : f32
    %6 = vector.broadcast %cst_6 : f32 to vector<16x64xf32>
    %7 = arith.mulf %6, %5 : vector<16x64xf32>
    %c1 = arith.constant 1 : index
    %c0_7 = arith.constant 0 : index
    %c0_8 = arith.constant 0 : index
    %8 = vector.load %arg3[%c1, %c0_7, %c0_8] : memref<3x16x64xf32, #tpu.memory_space<vmem>>, vector<1x16x64xf32>
    %9 = vector.shape_cast %8 : vector<1x16x64xf32> to vector<16x64xf32>
    %10 = vector.shape_cast %7 : vector<16x64xf32> to vector<1x16x64xf32>
    tpu.vector_store %arg3[%c1, %c0_7, %c0_8], %10 {strides = array<i32>} : memref<3x16x64xf32, #tpu.memory_space<vmem>>, vector<1x16x64xf32>,
    %cst_9 = arith.constant dense<0.000000e+00> : vector<16x64xf32>
    %11 = tpu.matmul %4, %7, %cst_9 {dimension_numbers = #tpu.dot_dimension_numbers<[1], [0], [0], [1], [0, 0, 1, 1], [], []>} : vector<16x16xf32>, vector<16x64xf32>, vector<16x64xf32> -> vector<16x64xf32>
    %12 = arith.subf %11, %0 : vector<16x64xf32>
    %c2 = arith.constant 2 : index
    %c0_10 = arith.constant 0 : index
    %c0_11 = arith.constant 0 : index
    %13 = vector.load %arg3[%c2, %c0_10, %c0_11] : memref<3x16x64xf32, #tpu.memory_space<vmem>>, vector<1x16x64xf32>
    %14 = vector.shape_cast %13 : vector<1x16x64xf32> to vector<16x64xf32>
    %15 = vector.shape_cast %12 : vector<16x64xf32> to vector<1x16x64xf32>
    tpu.vector_store %arg3[%c2, %c0_10, %c0_11], %15 {strides = array<i32>} : memref<3x16x64xf32, #tpu.memory_space<vmem>>, vector<1x16x64xf32>,
    return
  }
  func.func @transform_0(%arg0: i32) -> (i32, i32) {
    %c0_i32 = arith.constant 0 : i32
    %c0_i32_0 = arith.constant 0 : i32
    return %c0_i32, %arg0 : i32, i32
  }
  func.func @transform_1(%arg0: i32) -> (i32, i32) {
    %c0_i32 = arith.constant 0 : i32
    %c0_i32_0 = arith.constant 0 : i32
    %c0_i32_1 = arith.constant 0 : i32
    return %c0_i32, %c0_i32_0 : i32, i32
  }
  func.func @transform_2(%arg0: i32) -> (i32, i32, i32) {
    %c0_i32 = arith.constant 0 : i32
    %c0_i32_0 = arith.constant 0 : i32
    %c0_i32_1 = arith.constant 0 : i32
    return %c0_i32, %c0_i32_0, %arg0 : i32, i32, i32
  }
}

</mosaic_0001>

<bundles_post_ra>
// kernel: tpu_custom_call.1
= control target key start
LH: loop header
LB: loop body
LE: loop exit
PB: predicated region body
PF: predicated region fallthrough
CT: control target
= control target key end

     0   :  { %7 = vsyncpa [#allocation3], 0  ;;  %s377_s0 = inlined_call_operand.hbm [shape: f32[16,64], index: 0, kind: input, shape index: {}]   ;;  %s378_s1 = inlined_call_operand.hbm [shape: f32[16,16], index: 1, kind: input, shape index: {}]   ;;  %s379_s2 = inlined_call_operand.hbm [shape: f32[3,16,64], index: 2, kind: output, shape index: {}]  }
   0x1   :  { %8 = vsyncpa [#allocation6], 0 }
   0x2   :  { %9 = vsyncpa [#allocation4], 0  ;;  %s329_s9 = smov [#allocation2]  }
   0x3   :  { %s15_s10 = sshll.u32 %s329_s9, 4  ;;  %s16_s10 = int_to_ptr.vmem [resolvable:$true] %s15_s10 }
   0x4   :  { %s271_s11 = scalar_lea.vmem %s16_s10, 256  ;;  %p276_p1 = scmp.lt.s32.totalorder %s16_s10, %s16_s10 }
   0x5   :  { %p272_p0 = scmp.ne.s32.totalorder %s16_s10, %s271_s11  ;;  %p277_p2 = scmp.lt.s32.totalorder %s271_s11, %s271_s11 }
   0x7   :  { %p278_p3 = por %p277_p2, %p276_p1 }
   0x9   :  { %p279_p4 = pnand %p278_p3, %p272_p0 }
   0xb   :  { %282 = shalt.err (!%p279_p4)
}
   0xc   :  { %s330_s12 = smov 128   ;;  %s331_s13 = smov 8  }
   0xd   :  { %21 = dma.hbm_to_vmem [thread:$0]  %s377_s0, 256, %s16_s10, [#allocation3], %s330_s12, %s330_s12, %s331_s13  }
   0xe   :  { %s332_s16 = smov [#allocation5]  }
   0xf   :  { %s27_s17 = sshll.u32 %s332_s16, 4  ;;  %s28_s17 = int_to_ptr.vmem [resolvable:$true] %s27_s17 }
  0x10   :  { %s291_s18 = scalar_lea.vmem %s28_s17, 256  ;;  %p296_p6 = scmp.lt.s32.totalorder %s28_s17, %s28_s17 }
  0x11   :  { %p292_p5 = scmp.ne.s32.totalorder %s28_s17, %s291_s18  ;;  %p297_p7 = scmp.lt.s32.totalorder %s291_s18, %s291_s18 }
  0x13   :  { %p298_p8 = por %p297_p7, %p296_p6 }
  0x15   :  { %p299_p9 = pnand %p298_p8, %p292_p5 }
  0x17   :  { %302 = shalt.err (!%p299_p9)
}
  0x18   :  { %33 = dma.hbm_to_vmem [thread:$0]  %s378_s1, 256, %s28_s17, [#allocation6], %s330_s12, %s330_s12, %s331_s13  }
  0x19   :  { %323 = dma.done.wait [#allocation3], 256  }
  0x1a   :  { %324 = vsyncadd [#allocation3], 4294967040 }
  0x1b   :  { %325 = dma.done.wait [#allocation6], 256  }
  0x1c   :  { %326 = vsyncadd [#allocation6], 4294967040  ;;  %vm47_vm0 = vcmask 130048   ;;  %v41_v0 = vld [vmem:[#allocation2 + $0x8] sm:$0xff]  ;;  %vm42_vm1 = vcmask 523264   ;;  %v40_v1 = vld [vmem:[#allocation2] sm:$0xff] }
  0x1d   :  { %v45_v2 = vld [vmem:[#allocation5] sm:$0xff]  ;;  %44 = vst.msk [vmem:[#allocation7 + $0x8] sm:$0xff] %vm42_vm1, %v41_v0  ;;  %244 = vmatprep.subr.mxu0 %v41_v0  ;;  %43 = vst.msk [vmem:[#allocation7] sm:$0xff] %vm42_vm1, %v40_v1  ;;  %v46_v3 = vld [vmem:[#allocation5 + $0x8] sm:$0xff]  ;;  %s333_s0 = smov [#allocation7]  }
  0x1e   :  { %248 = vmatprep.mubr.msk.f32.mxu0 %vm47_vm0, %v45_v2  ;;  %245 = vmatpush3.msra.mxu0 %v41_v0  ;;  %s219_s1 = sshll.u32 %s333_s0, 4  ;;  %s220_s1 = int_to_ptr.vmem [resolvable:$true] %s219_s1 }
  0x1f   :  { %255 = vmatprep.mubr.msk.f32.mxu1 %vm47_vm0, %v45_v2  ;;  %246 = vmatprep.subr.mxu0 %v40_v1  ;;  %s303_s21 = scalar_lea.vmem %s220_s1, 768  ;;  %p308_p11 = scmp.lt.s32.totalorder %s220_s1, %s220_s1 }
  0x20   :  { %247 = vmatpush3.msra.mxu0 %v40_v1  ;;  %p304_p10 = scmp.ne.s32.totalorder %s220_s1, %s303_s21  ;;  %p309_p12 = scmp.lt.s32.totalorder %s303_s21, %s303_s21 }
  0x21   :  { %249 = vmatmul.mubr.msk.f32.vlgmr.msra.gmra.mxu0 %vm47_vm0, %v46_v3 }
  0x22   :  { %p310_p13 = por %p309_p12, %p308_p11 }
  0x24   :  { %p311_p0 = pnand %p310_p13, %p304_p10 }
  0xe1   :  { %v250_v4 = vpop.f32.mrf.mxu0 }
  0xe2   :  { %v130_v5 = vmul.f32 0.5, %v250_v4 }
  0xe3   :  { %v120_v6 = vpop.f32.mrf.mxu0 }
  0xe4   :  { %133 = vst.msk [vmem:[#allocation7 + $0x18] sm:$0xff] %vm42_vm1, %v130_v5  ;;  %v129_v7 = vmul.f32 0.5, %v120_v6  ;;  %251 = vmatprep.subr.mxu1 %v130_v5 }
  0xe5   :  { %252 = vmatpush3.msra.mxu1 %v130_v5 }
  0xe6   :  { %132 = vst.msk [vmem:[#allocation7 + $0x10] sm:$0xff] %vm42_vm1, %v129_v7  ;;  %253 = vmatprep.subr.mxu1 %v129_v7 }
  0xe7   :  { %254 = vmatpush3.msra.mxu1 %v129_v7 }
  0xe8   :  { %256 = vmatmul.mubr.msk.f32.vlgmr.msra.gmra.mxu1 %vm47_vm0, %v46_v3 }
 0x1a8   :  { %v257_v8 = vpop.f32.mrf.mxu1 }
 0x1a9   :  { %v210_v9 = vsub.f32 %v257_v8, %v41_v0 }
 0x1aa   :  { %v200_v10 = vpop.f32.mrf.mxu1 }
 0x1ab   :  { %213 = vst.msk [vmem:[#allocation7 + $0x28] sm:$0xff] %vm42_vm1, %v210_v9  ;;  %v209_v11 = vsub.f32 %v200_v10, %v40_v1 }
 0x1ad   :  { %212 = vst.msk [vmem:[#allocation7 + $0x20] sm:$0xff] %vm42_vm1, %v209_v11 }
 0x1ae   :  { %314 = shalt.err (!%p311_p0)
}
 0x1af   :  { %225 = dma.vmem_to_hbm [thread:$0]  %s220_s1, 768, %s379_s2, [#allocation4], %s330_s12, %s330_s12, %s331_s13  }
 0x1b0   :  { %327 = dma.done.wait [#allocation4], 768  }
 0x1b1   :  { %328 = vsyncadd [#allocation4], 4294966528 }
 0x1b2   :  { %229 = vsyncpa [#allocation3], 1 }
 0x1b3   :  { %230 = vsyncpa [#allocation6], 1 }
 0x1b4   :  { %231 = vsyncpa [#allocation4], 1 }

</bundles_post_ra>
